<compile_context>
chip_gen: v5e
topology: v5e:2x2
jax: 0.10.0
libtpu: 0.0.40
codegen_flags: <defaults>
</compile_context>

<pallas_src>
import math

import jax
import jax.numpy as jnp
from jax.experimental import pallas as pl
from jax.experimental.pallas import tpu as pltpu


def _round_up(n, m):
    return ((n + m - 1) // m) * m


def _vmem_budget():
    """(working-set budget bytes, vmem_limit_bytes) tuned per TPU generation."""
    try:
        kind = jax.devices()[0].device_kind.lower()
    except Exception:
        kind = ""
    mib = 1024 * 1024
    if "v6" in kind:                       # v6e: 32 MiB scoped / 128 MiB physical
        return 24 * mib, 64 * mib
    if "v7" in kind:                       # v7x: 64 MiB physical -> stay well under
        return 20 * mib, 48 * mib
    if "v5e" in kind or "lite" in kind:    # v5e: 16 MiB scoped / 128 MiB physical
        return 12 * mib, 24 * mib
    if "v2" in kind or "v3" in kind:       # small VMEM parts: keep defaults
        return 6 * mib, None
    return 16 * mib, 32 * mib              # v4 / v5p / unknown: conservative


def _choose_tile_m(M, row_bytes, fixed_bytes, align, budget):
    """Largest row tile that (a) divides M, (b) is a multiple of `align`,
    (c) keeps the double-buffered working set inside `budget`, and
    (d) leaves >= 2 grid steps when possible (v7x has 2 TensorCores)."""
    avail = max(budget - fixed_bytes, align * row_bytes)
    cap = min(max(align, avail // row_bytes), 2048, M)
    best = None
    t = (cap // align) * align
    while t >= align:
        if M % t == 0:
            if best is None:
                best = t
            if M // t >= 2:
                return t
        t -= align
    return best if best is not None else M  # tiny / awkward M: single full block


def _token_embed_kernel(x_ref, w_ref, b_ref, o_ref):
    # x_ref: (TM, 3C)  w_ref: (3C, D)  b_ref: (1, D)  o_ref: (TM, D)
    y = jnp.dot(x_ref[...], w_ref[...], preferred_element_type=jnp.float32)
    o_ref[...] = (y + b_ref[...]).astype(o_ref.dtype)


def token_embedding(x, weight, bias, *, param_dtype=None, out_dtype=None, tile_m=None):
    """Circular 3-tap Conv1d (Informer TokenEmbedding) as one fused matmul.

    x:      (B, L, c_in)  (also accepts (L, c_in) or (B, L, c_in, 1), like the
            torch module's dim==2 / dim==4 handling)
    weight: (3, c_in, d_model), weight[k] = pytorch_conv_weight[:, :, k].T
    bias:   (d_model,)
    returns (B, L, d_model) in out_dtype (default: x.dtype)
    """
    # TODO(synk): torch sparse inputs (x.is_sparse -> to_dense) have no JAX analog here.
    if x.ndim == 2:
        x = x[None]
    elif x.ndim == 4:
        x = jnp.squeeze(x, axis=-1)
    B, L, C = x.shape
    D = weight.shape[-1]
    if out_dtype is None:
        out_dtype = x.dtype

    # im2col for the circular 3-tap conv: columns are [x[t-1] | x[t] | x[t+1]].
    # The wrap is per-batch along L, so flattening B*L afterwards is exact.
    # TODO(synk): for large c_in (3C ~ d_model) skip this HBM materialization and
    # instead load a 2-row halo per tile inside the kernel (scalar-prefetched
    # wrap-row indices) to avoid the extra 3x read/write of x.
    x_cat = jnp.concatenate(
        [jnp.roll(x, 1, axis=1), x, jnp.roll(x, -1, axis=1)], axis=-1
    )  # (B, L, 3C)
    w_flat = weight.reshape(3 * C, D)                 # rows: [W0; W1; W2]
    bias2d = bias.reshape(1, D).astype(jnp.float32)

    if param_dtype is not None:
        # Narrow matmul operands; accumulation stays f32 in the kernel.
        x_cat = x_cat.astype(param_dtype)
        w_flat = w_flat.astype(param_dtype)

    M = B * L
    x2d = x_cat.reshape(M, 3 * C)

    x_isz = x2d.dtype.itemsize
    w_isz = w_flat.dtype.itemsize
    o_isz = jnp.dtype(out_dtype).itemsize

    budget, vmem_limit = _vmem_budget()
    if tile_m is None:
        align = 16 if x_isz < 4 else 8
        # VMEM working set per row, using lane-padded layouts; weight/bias are
        # constant-index blocks but still counted x2 to stay conservative.
        lane_in = _round_up(3 * C, 128)
        lane_d = _round_up(D, 128)
        row_bytes = 2 * (lane_in * x_isz + lane_d * o_isz)
        fixed_bytes = 2 * (_round_up(3 * C, 8) * lane_d * w_isz + 8 * lane_d * 4)
        tile_m = _choose_tile_m(M, row_bytes, fixed_bytes, align, budget)
    assert M % tile_m == 0
    grid = (M // tile_m,)

    cost = pl.CostEstimate(
        flops=2 * M * (3 * C) * D,
        transcendentals=0,
        bytes_accessed=(
            x2d.size * x_isz + w_flat.size * w_isz + bias2d.size * 4 + M * D * o_isz
        ),
    )

    out2d = pl.pallas_call(
        _token_embed_kernel,
        out_shape=jax.ShapeDtypeStruct((M, D), out_dtype),
        grid_spec=pltpu.PrefetchScalarGridSpec(
            num_scalar_prefetch=0,
            grid=grid,
            in_specs=[
                pl.BlockSpec((tile_m, 3 * C), lambda i: (i, 0)),
                pl.BlockSpec((3 * C, D), lambda i: (0, 0)),   # resident weight
                pl.BlockSpec((1, D), lambda i: (0, 0)),       # resident bias
            ],
            out_specs=pl.BlockSpec((tile_m, D), lambda i: (i, 0)),
        ),
        compiler_params=pltpu.CompilerParams(
            dimension_semantics=("parallel",),
            vmem_limit_bytes=vmem_limit,
        ),
        cost_estimate=cost,
    )(x2d, w_flat, bias2d)

    return out2d.reshape(B, L, D)


def _reference(x, weight, bias):
    # Pure-JAX circular conv reference (same math, channels-last, f32-accurate).
    hi = jax.lax.Precision.HIGHEST
    x_prev = jnp.roll(x, 1, axis=1)
    x_next = jnp.roll(x, -1, axis=1)
    return (
        jnp.einsum("blc,cd->bld", x_prev, weight[0], precision=hi)
        + jnp.einsum("blc,cd->bld", x, weight[1], precision=hi)
        + jnp.einsum("blc,cd->bld", x_next, weight[2], precision=hi)
        + bias[None, None, :]
    )


if __name__ == "__main__":
    B, L, c_in, d_model = 2, 8, 4, 32

    key = jax.random.PRNGKey(0)
    kx, kw, kb = jax.random.split(key, 3)

    x = jax.random.normal(kx, (B, L, c_in), dtype=jnp.float32)

    # Conv1d weight (d_model, c_in, 3), kaiming_normal_(mode='fan_in',
    # nonlinearity='leaky_relu', a=0): std = sqrt(2) / sqrt(c_in * 3)
    fan_in = c_in * 3
    std = math.sqrt(2.0) / math.sqrt(fan_in)
    w_pt = jax.random.normal(kw, (d_model, c_in, 3), dtype=jnp.float32) * std
    # Conv1d default bias init: U(-1/sqrt(fan_in), 1/sqrt(fan_in))
    bound = 1.0 / math.sqrt(fan_in)
    bias = jax.random.uniform(
        kb, (d_model,), dtype=jnp.float32, minval=-bound, maxval=bound
    )

    # Repack to (3, c_in, d_model): weight[k] = w_pt[:, :, k].T
    weight = jnp.transpose(w_pt, (2, 1, 0))

    out = jax.block_until_ready(token_embedding(x, weight, bias))

    ref = _reference(x, weight, bias)
    assert out.shape == (B, L, d_model)
    assert out.dtype == x.dtype
    assert jnp.allclose(out, ref, atol=1e-4, rtol=1e-4), "mismatch vs reference"

    print("KERNEL_OK")
</pallas_src>

<mosaic_0001>
module attributes {stable_mosaic.version = 11 : i64} {
  func.func @_token_embed_kernel(%arg0: i32, %arg1: memref<8x12xf32, #tpu.memory_space<vmem>>, %arg2: memref<12x32xf32, #tpu.memory_space<vmem>>, %arg3: memref<1x32xf32, #tpu.memory_space<vmem>>, %arg4: memref<8x32xf32, #tpu.memory_space<vmem>>) attributes {dimension_semantics = [#tpu.dimension_semantics<parallel>], iteration_bounds = array<i64: 2>, scalar_prefetch = 0 : i64, scratch_operands = 0 : i64, tpu.core_type = #tpu.core_type<tc>, window_params = [{transform_indices = @transform_0, window_bounds = array<i64: 8, 12>}, {pipeline_mode = #tpu.pipeline_mode<synchronous>, transform_indices = @transform_1, window_bounds = array<i64: 12, 32>}, {pipeline_mode = #tpu.pipeline_mode<synchronous>, transform_indices = @transform_2, window_bounds = array<i64: 1, 32>}, {transform_indices = @transform_3, window_bounds = array<i64: 8, 32>}]} {
    %c0 = arith.constant 0 : index
    %c0_0 = arith.constant 0 : index
    %0 = vector.load %arg1[%c0, %c0_0] : memref<8x12xf32, #tpu.memory_space<vmem>>, vector<8x12xf32>
    %c0_1 = arith.constant 0 : index
    %c0_2 = arith.constant 0 : index
    %1 = vector.load %arg2[%c0_1, %c0_2] : memref<12x32xf32, #tpu.memory_space<vmem>>, vector<12x32xf32>
    %cst = arith.constant dense<0.000000e+00> : vector<8x32xf32>
    %2 = tpu.matmul %0, %1, %cst {dimension_numbers = #tpu.dot_dimension_numbers<[1], [0], [0], [1], [0, 0, 1, 1], [], []>} : vector<8x12xf32>, vector<12x32xf32>, vector<8x32xf32> -> vector<8x32xf32>
    %c0_3 = arith.constant 0 : index
    %c0_4 = arith.constant 0 : index
    %3 = vector.load %arg3[%c0_3, %c0_4] : memref<1x32xf32, #tpu.memory_space<vmem>>, vector<1x32xf32>
    %4 = vector.broadcast %3 : vector<1x32xf32> to vector<8x32xf32>
    %5 = arith.addf %2, %4 : vector<8x32xf32>
    %c0_5 = arith.constant 0 : index
    %c0_6 = arith.constant 0 : index
    %6 = vector.load %arg4[%c0_5, %c0_6] : memref<8x32xf32, #tpu.memory_space<vmem>>, vector<8x32xf32>
    tpu.vector_store %arg4[%c0_5, %c0_6], %5 {strides = array<i32>} : memref<8x32xf32, #tpu.memory_space<vmem>>, vector<8x32xf32>,
    return
  }
  func.func @transform_0(%arg0: i32) -> (i32, i32) {
    %c0_i32 = arith.constant 0 : i32
    %c0_i32_0 = arith.constant 0 : i32
    return %arg0, %c0_i32 : i32, i32
  }
  func.func @transform_1(%arg0: i32) -> (i32, i32) {
    %c0_i32 = arith.constant 0 : i32
    %c0_i32_0 = arith.constant 0 : i32
    %c0_i32_1 = arith.constant 0 : i32
    return %c0_i32, %c0_i32_0 : i32, i32
  }
  func.func @transform_2(%arg0: i32) -> (i32, i32) {
    %c0_i32 = arith.constant 0 : i32
    %c0_i32_0 = arith.constant 0 : i32
    %c0_i32_1 = arith.constant 0 : i32
    return %c0_i32, %c0_i32_0 : i32, i32
  }
  func.func @transform_3(%arg0: i32) -> (i32, i32) {
    %c0_i32 = arith.constant 0 : i32
    %c0_i32_0 = arith.constant 0 : i32
    return %arg0, %c0_i32 : i32, i32
  }
}

</mosaic_0001>

<bundles_post_ra>
// kernel: tpu_custom_call.1
= control target key start
LH: loop header
LB: loop body
LE: loop exit
PB: predicated region body
PF: predicated region fallthrough
CT: control target
= control target key end

     0   :  { %8 = vsyncpa [#allocation3], 0  ;;  %s708_s0 = inlined_call_operand.hbm [shape: f32[16,12], index: 0, kind: input, shape index: {}]   ;;  %s709_s1 = inlined_call_operand.hbm [shape: f32[12,32], index: 1, kind: input, shape index: {}]   ;;  %s710_s2 = inlined_call_operand.vmem [shape: f32[1,32], index: 2, kind: input, shape index: {}]   ;;  %s711_s3 = inlined_call_operand.hbm [shape: f32[16,32], index: 3, kind: output, shape index: {}]  }
   0x1   :  { %10 = vsyncpa [#allocation3 + $0x1], 0 }
   0x2   :  { %11 = vsyncpa [#allocation6], 0 }
   0x3   :  { %12 = vsyncpa [#allocation4], 0 }
   0x4   :  { %14 = vsyncpa [#allocation4 + $0x1], 0  ;;  %s569_s12 = smov 0   ;;  %s571_s13 = smov 0  }
   0x5   :  { %s573_s14 = smov 0   ;;  %s575_s15 = smov 0  }
   0x6 LB: > { %s130_s18 = sshll.u32 %s709_s1, 4  ;;  %s593_s19 = sadd.s32 4294967295, %s544_s15   ;;  %s544_s15 = sphi %s575_s15, %s721_s15   ;;  %s540_s14 = sphi %s573_s14, %s720_s14   ;;  %s536_s13 = sphi %s571_s13, %s719_s13   ;;  %s532_s12 = sphi %s569_s12, %s718_s12   ;;  %s131_s18 = int_to_ptr.hbm [resolvable:$true] %s130_s18 }
   0x7   : > { %p339_p0 = scmp.ge.s32.totalorder %s544_s15, 1  ;;  %p41_p1 = scmp.eq.s32.totalorder %s593_s19, 0 }
   0x8   : > { %p119_p2 = scmp.lt.s32.totalorder %s544_s15, 3  ;;  %s546_s21 = smov [#allocation5]  }
   0x9   : > { %s132_s22 = sshll.u32 %s546_s21, 4  ;;  %s547_s23 = smov 128   ;;  %s133_s22 = int_to_ptr.vmem [resolvable:$true] %s132_s22 }
   0xa   : > { %p598_p3 = pnand %p339_p0, %p119_p2  ;;  %s548_s24 = smov 8  }
   0xb   : > { %s338_s25 = sadd.s32 4294967294, %s544_s15   ;;  %s609_s26 = sadd.s32 1, %s544_s15  }
   0xc   : > { %p362_p4 = pneg %p598_p3  ;;  %s27_s27 = sadd.s32 1, %s540_s14 }
   0xd   : > { %s24_s28 = ssub.s32 %s544_s15, %s609_s26  ;;  %p34_p7 = scmp.ne.s32.totalorder %s540_s14, %s536_s13 }
   0xe   : > { %p363_p6 = pnand %p362_p4, %p41_p1  ;;  %p25_p8 = scmp.eq.s32.totalorder %s24_s28, 0 }
   0xf   : > { %p35_p9 = scmp.eq.s32.totalorder %s544_s15, 0  ;;  %p40_p10 = scmp.ne.s32.totalorder %s536_s13, %s532_s12 }
  0x10   : > { %365 = dma.hbm_to_vmem [thread:$0]  (!%p363_p6), %s131_s18, 256, %s133_s22, [#allocation6], %s547_s23, %s547_s23, %s548_s24  }
  0x11   : > { %p106_p11 = scmp.eq.s32.totalorder %s593_s19, 1  ;;  %p625_p12 = por %p41_p1, %p40_p10 }
  0x12   : > { %s621_s29 = scalar_select %p25_p8, %s540_s14, %s27_s27  }
  0x13   : > { %p629_p13 = por %p106_p11, %p34_p7  ;;  %p112_p0 = scmp.eq.s32.totalorder %s338_s25, 1 }
  0x14   : > { %p36_p2 = por %p35_p9, %p34_p7  ;;  %s149_s5 = sand.u32 1, %s540_s14  }
  0x15   : > { %p634_p4 = por %p112_p0, %p40_p10  ;;  %p375_p6 = scmp.lt.s32.totalorder %s544_s15, 2 }
  0x16   : > { %s342_s7 = sshll.u32 %s149_s5, 3  ;;  %s343_s8 = sshll.u32 %s544_s15, 3 }
  0x17   : > { %s157_s11 = scalar_lea.hbm %s708_s0, %s343_s8  ;;  %s153_s17 = scalar_lea.vmem [#allocation2], %s342_s7 }
  0x18   : > { %s159_s16 = sshll.u32 %s157_s11, 4  ;;  %s161_s18 = sshll.u32 %s153_s17, 4  ;;  %s160_s16 = int_to_ptr.hbm [resolvable:$true] %s159_s16  ;;  %s162_s18 = int_to_ptr.vmem [resolvable:$true] %s161_s18 }
  0x19   : > { %p643_p8 = pnand %p375_p6, %p36_p2  ;;  %s150_s22 = scalar_lea.sflag [#allocation3], %s149_s5 }
  0x1a   : > { %s444_s23 = sshra.s32 %s160_s16, 4  ;;  %s451_s28 = scalar_lea.hbm %s708_s0, 16  ;;  %s445_s23 = int_to_ptr.hbm [resolvable:$true] %s444_s23 }
  0x1b   : > { %s446_s24 = scalar_lea.hbm %s445_s23, 8  ;;  %p448_p9 = pneg %p643_p8 }
  0x1c   : > { %p447_p7 = scmp.ne.s32.totalorder %s445_s23, %s446_s24  ;;  %p452_p0 = scmp.lt.s32.totalorder %s445_s23, %s708_s0 }
  0x1d   : > { %p453_p2 = scmp.lt.s32.totalorder %s451_s28, %s446_s24 }
  0x1e   : > { %p449_p10 = pnand %p448_p9, %p447_p7 }
  0x1f   : > { %p454_p6 = por %p453_p2, %p452_p0 }
  0x20   : > { %p450_p11 = pneg %p449_p10 }
  0x22   : > { %p455_p5 = pnand %p454_p6, %p450_p11 }
  0x24   : > { %458 = shalt.err (!%p455_p5)
}
  0x25   : > { %369 = dma.hbm_to_vmem [thread:$0]  (!%p643_p8), %s160_s16, 128, %s162_s18, %s150_s22  }
  0x26   : > { %170 = sbr.rel (%p598_p3) target bundleno = 181 (0xb5), region = 32  ;;  %s660_s5 = sand.u32 (!%p598_p3), 1, %s536_s13  }
  0x27   : > { %s345_s9 = sshll.u32 (!%p598_p3), %s660_s5, 3  ;;  %s173_s10 = scalar_lea.sflag (!%p598_p3), [#allocation3], %s660_s5 }
  0x28   : > { %s176_s11 = scalar_lea.vmem (!%p598_p3), [#allocation2], %s345_s9 }
  0x2b   : > { %519 = dma.done.wait (%p625_p12), %s173_s10, 128  }
  0x2c   : > { %521 = vsyncadd (%p625_p12), %s173_s10, 4294967168 }
  0x2d   : > { %523 = dma.done.wait (%p41_p1), [#allocation6], 256  }
  0x2e   : > { %525 = vsyncadd (%p41_p1), [#allocation6], 4294967040  ;;  %vm216_vm0 = vcmask 1043456   ;;  %v207_v0 = vld [vmem:[#allocation5 + $0x8] sm:$0xf]  ;;  %v206_v1 = vld [vmem:[#allocation5] sm:$0xff] }
  0x2f   : > { %348 = vmatpush.msk.msra.mxu0 %vm216_vm0, %v207_v0  ;;  %v205_v2 = vld [vmem:[%s176_s11] sm:$0xff]  ;;  %vm212_vm1 = vcmask 97280   ;;  %s351_s20 = sshll.u32 %s593_s19, 3  ;;  %s204_s22 = scalar_lea.vmem [#allocation7], %s345_s9  ;;  %vm240_vm2 = vcmask 261120  }
  0x30   : > { %s253_s17 = scalar_lea.hbm %s711_s3, %s351_s20  ;;  %v413_v3 = vld [vmem:[%s710_s2] ss:$0 sm:$0xff]  ;;  %s255_s23 = sshll.u32 %s204_s22, 4  ;;  %s256_s23 = int_to_ptr.vmem [resolvable:$true] %s255_s23 }
  0x31   : > { %235 = vmatpush.msra.mxu0 %v206_v1  ;;  %s257_s24 = sshll.u32 %s253_s17, 4  ;;  %s243_s25 = scalar_lea.sflag [#allocation4], %s660_s5  ;;  %s258_s24 = int_to_ptr.hbm [resolvable:$true] %s257_s24 }
  0x32   : > { %349 = vmatmul.msk.f32.vlgmr.msra.gmra.mxu0 %vm212_vm1, %v205_v2  ;;  %s488_s19 = sshra.s32 %s258_s24, 4  ;;  %s494_s8 = scalar_lea.hbm %s711_s3, 16  ;;  %s489_s19 = int_to_ptr.hbm [resolvable:$true] %s488_s19 }
  0x33   : > { %s490_s27 = scalar_lea.hbm %s489_s19, 8  ;;  %p495_p12 = scmp.lt.s32.totalorder %s489_s19, %s711_s3 }
  0x34   : > { %p491_p1 = scmp.ne.s32.totalorder %s489_s19, %s490_s27  ;;  %p496_p8 = scmp.lt.s32.totalorder %s494_s8, %s490_s27 }
  0x36   : > { %p492_p3 = pnand %p491_p1, %p629_p13  ;;  %p497_p7 = por %p496_p8, %p495_p12 }
  0x38   : > { %p493_p5 = pneg %p492_p3 }
  0x3a   : > { %p498_p9 = pnand %p497_p7, %p493_p5 }
  0xaf   : > { %v237_v4 = vpop.f32.mrf.mxu0 }
  0xb0   : > { %v238_v5 = vadd.f32 %v413_v3, %v237_v4 }
  0xb2   : > { %241 = vst.msk [vmem:[%s204_s22] sm:$0xff] %vm240_vm2, %v238_v5 }
  0xb3   : > { %501 = shalt.err (!%p498_p9)
}
  0xb4   : > { %360 = dma.vmem_to_hbm [thread:$0]  (%p629_p13), %s256_s23, 128, %s258_s24, %s243_s25  }
  0xb5 PF: > { %s269_s5 = sand.u32 1, %s532_s12   ;;  %p717_p10 = scmp.ge.s32.totalorder %s544_s15, 2 }
  0xb6   : > { %s270_s11 = scalar_lea.sflag [#allocation4], %s269_s5 }
  0xb7   : > { %p371_p11 = pnand %p717_p10, %p634_p4 }
  0xb9   : > { %p372_p0 = pneg %p371_p11 }
  0xbb   : > { %527 = dma.done.wait (%p372_p0), %s270_s11, 128  }
  0xbc   : > { %529 = vsyncadd (%p372_p0), %s270_s11, 4294967168  ;;  %p17_p2 = scmp.ge.s32.totalorder %s609_s26, 4   ;;  %s718_s12 = smov %s536_s13 }
  0xbd   : > { %s719_s13 = smov %s540_s14  ;;  %s720_s14 = smov %s621_s29 }
  0xbe   : > { %s721_s15 = smov %s609_s26  ;;  %19 = sbr.rel (!%p17_p2) target bundleno = 6 (0x6), region = 81 }
  0xc3   :  { %276 = vsyncpa [#allocation3], 1 }
  0xc4   :  { %278 = vsyncpa [#allocation3 + $0x1], 1 }
  0xc5   :  { %279 = vsyncpa [#allocation6], 1 }
  0xc6   :  { %280 = vsyncpa [#allocation4], 1 }
  0xc7   :  { %282 = vsyncpa [#allocation4 + $0x1], 1 }

</bundles_post_ra>
